<compile_context>
chip_gen: v5e
topology: v5e:2x2
jax: 0.10.0
libtpu: 0.0.40
codegen_flags: <defaults>
</compile_context>

<pallas_src>
import functools

import jax
import jax.numpy as jnp
from jax.experimental import pallas as pl
from jax.experimental.pallas import tpu as pltpu


# ----------------------------------------------------------------------------
# Kernels
# ----------------------------------------------------------------------------
def hjb_full_kernel(
    state_ref, action_ref,
    enc_w1, enc_b1,        # state_encoder layer 1
    w_cat, w_act, b_cat,   # merged (value | hamiltonian) hidden layer, enc_w2 folded
    head_w, head_b,        # fused block-diagonal (2H, 2) head: [value | hamiltonian]
    out_ref,
):
    s = state_ref[...]
    a = action_ref[...]

    # state_encoder layer 1 (the only un-folded encoder matmul)
    h1 = jnp.tanh(
        jnp.dot(s, enc_w1[...], preferred_element_type=jnp.float32) + enc_b1[...]
    )

    # Merged hidden layer: one (TB,H)x(H,2H) matmul + one (TB,A)x(A,2H) matmul
    # (action columns are exactly zero in the value half) + one tanh over a
    # contiguous (TB,2H) tile.  No in-kernel concatenate / relayout.
    z = jnp.tanh(
        jnp.dot(h1, w_cat[...], preferred_element_type=jnp.float32)
        + jnp.dot(a, w_act[...], preferred_element_type=jnp.float32)
        + b_cat[...]
    )

    # Fused heads: one (TB,2H)x(2H,2) matmul, one (TB,2) store.
    out_ref[...] = (
        jnp.dot(z, head_w[...], preferred_element_type=jnp.float32) + head_b[...]
    )


def hjb_value_kernel(
    state_ref,
    enc_w1, enc_b1,
    w_ev, b_ev,
    val_w2, val_b2,
    out_ref,
):
    s = state_ref[...]
    h1 = jnp.tanh(
        jnp.dot(s, enc_w1[...], preferred_element_type=jnp.float32) + enc_b1[...]
    )
    v1 = jnp.tanh(
        jnp.dot(h1, w_ev[...], preferred_element_type=jnp.float32) + b_ev[...]
    )
    out_ref[...] = (
        jnp.dot(v1, val_w2[...], preferred_element_type=jnp.float32) + val_b2[...]
    )


# ----------------------------------------------------------------------------
# Parameters (deterministic synthetic init) + host-side weight preparation
# ----------------------------------------------------------------------------
def init_params(key, state_dim, action_dim, hidden_dim):
    ks = jax.random.split(key, 6)
    scale = 0.1

    def lin(k, fan_in, fan_out):
        kw, kb = jax.random.split(k)
        w = scale * jax.random.normal(kw, (fan_in, fan_out), jnp.float32)
        b = scale * jax.random.normal(kb, (1, fan_out), jnp.float32)
        return w, b

    enc_w1, enc_b1 = lin(ks[0], state_dim, hidden_dim)
    enc_w2, enc_b2 = lin(ks[1], hidden_dim, hidden_dim)
    val_w1, val_b1 = lin(ks[2], hidden_dim, hidden_dim)
    val_w2, val_b2 = lin(ks[3], hidden_dim, 1)
    ham_w1, ham_b1 = lin(ks[4], hidden_dim + action_dim, hidden_dim)
    ham_w2, ham_b2 = lin(ks[5], hidden_dim, 1)

    return dict(
        enc_w1=enc_w1, enc_b1=enc_b1, enc_w2=enc_w2, enc_b2=enc_b2,
        val_w1=val_w1, val_b1=val_b1, val_w2=val_w2, val_b2=val_b2,
        ham_w1=ham_w1, ham_b1=ham_b1, ham_w2=ham_w2, ham_b2=ham_b2,
    )


def prepare_params(raw):
    """Fold enc_w2 into downstream layers, merge value/ham hidden layers, fuse heads."""
    H = raw["enc_w2"].shape[0]
    ham_w1s = raw["ham_w1"][:H]      # multiplies state_features
    ham_w1a = raw["ham_w1"][H:]      # multiplies action
    A = ham_w1a.shape[0]

    # sf = h1 @ enc_w2 + enc_b2 is never output -> fold it into both branches.
    w_ev = raw["enc_w2"] @ raw["val_w1"]
    b_ev = raw["enc_b2"] @ raw["val_w1"] + raw["val_b1"]
    w_eh = raw["enc_w2"] @ ham_w1s
    b_eh = raw["enc_b2"] @ ham_w1s + raw["ham_b1"]

    # Merged hidden layer (value | hamiltonian) -> one (H, 2H) matmul in-kernel.
    w_cat = jnp.concatenate([w_ev, w_eh], axis=1)                        # (H, 2H)
    b_cat = jnp.concatenate([b_ev, b_eh], axis=1)                        # (1, 2H)
    w_act = jnp.concatenate(
        [jnp.zeros((A, H), jnp.float32), ham_w1a], axis=1)               # (A, 2H)

    # Block-diagonal fused head: z @ head_w -> (TB, 2) = [value, hamiltonian].
    z0 = jnp.zeros((H, 1), jnp.float32)
    head_w = jnp.concatenate(
        [jnp.concatenate([raw["val_w2"], z0], axis=1),
         jnp.concatenate([z0, raw["ham_w2"]], axis=1)],
        axis=0,
    )                                                                     # (2H, 2)
    head_b = jnp.concatenate([raw["val_b2"], raw["ham_b2"]], axis=1)      # (1, 2)

    return dict(
        enc_w1=raw["enc_w1"], enc_b1=raw["enc_b1"],
        w_cat=w_cat, w_act=w_act, b_cat=b_cat,
        head_w=head_w, head_b=head_b,
        # value-only (action=None) path keeps the un-merged value branch
        w_ev=w_ev, b_ev=b_ev,
        val_w2=raw["val_w2"], val_b2=raw["val_b2"],
    )


# ----------------------------------------------------------------------------
# Wrappers
# ----------------------------------------------------------------------------
def _round_up(x, m):
    return (x + m - 1) // m * m


def _choose_tb(B, tb):
    """Pick a batch tile: multiple of 8, <= tb, and >= 2 grid steps when possible."""
    tb = max(8, _round_up(int(tb), 8))          # never emit a non-8-multiple block
    TB = min(tb, _round_up(B, 8))
    # Guarantee >= 2 grid steps whenever the batch can be split into >=8-row
    # halves, so the "parallel" batch axis shards across both v7x TensorCores.
    # Costs one extra ~0.35us grid step on single-TC v5e/v6e (negligible).
    if pl.cdiv(B, TB) < 2 and B >= 16:
        TB = _round_up(pl.cdiv(B, 2), 8)
    return TB


def _const_spec(arr):
    # Full-array block with a constant index_map -> stays VMEM-resident across
    # all grid steps (same block index, no re-DMA).
    return pl.BlockSpec(arr.shape, lambda i: (0,) * arr.ndim)


@functools.partial(jax.jit, static_argnames=("tb",))
def _hjb_full_call(state, action, pp, tb=2048):
    B, S = state.shape
    A = action.shape[1]
    TB = _choose_tb(B, tb)
    grid = (pl.cdiv(B, TB),)    # no host-side pad: tail block is a masked partial block

    weights = [
        pp["enc_w1"], pp["enc_b1"],
        pp["w_cat"], pp["w_act"], pp["b_cat"],
        pp["head_w"], pp["head_b"],
    ]

    out = pl.pallas_call(
        hjb_full_kernel,
        out_shape=jax.ShapeDtypeStruct((B, 2), jnp.float32),
        grid=grid,
        in_specs=[
            pl.BlockSpec((TB, S), lambda i: (i, 0)),
            pl.BlockSpec((TB, A), lambda i: (i, 0)),
        ] + [_const_spec(w) for w in weights],
        out_specs=pl.BlockSpec((TB, 2), lambda i: (i, 0)),
        compiler_params=pltpu.CompilerParams(
            dimension_semantics=("parallel",),
        ),
    )(state, action, *weights)

    return out[:, 0:1], out[:, 1:2]


@functools.partial(jax.jit, static_argnames=("tb",))
def _hjb_value_call(state, pp, tb=2048):
    B, S = state.shape
    TB = _choose_tb(B, tb)
    grid = (pl.cdiv(B, TB),)

    weights = [
        pp["enc_w1"], pp["enc_b1"],
        pp["w_ev"], pp["b_ev"],
        pp["val_w2"], pp["val_b2"],
    ]

    out = pl.pallas_call(
        hjb_value_kernel,
        out_shape=jax.ShapeDtypeStruct((B, 1), jnp.float32),
        grid=grid,
        in_specs=[pl.BlockSpec((TB, S), lambda i: (i, 0))]
                 + [_const_spec(w) for w in weights],
        out_specs=pl.BlockSpec((TB, 1), lambda i: (i, 0)),
        compiler_params=pltpu.CompilerParams(
            dimension_semantics=("parallel",),
        ),
    )(state, *weights)

    return out


def hjb_forward(state, action, prepared_params, tb=2048):
    """Mirrors HJBValueNetwork.forward: returns (value, hamiltonian or None)."""
    if action is None:
        return _hjb_value_call(state, prepared_params, tb=tb), None
    return _hjb_full_call(state, action, prepared_params, tb=tb)


# ----------------------------------------------------------------------------
# Pure-JAX reference (same math as the PyTorch module, un-folded)
# ----------------------------------------------------------------------------
def hjb_reference(state, action, p):
    h1 = jnp.tanh(state @ p["enc_w1"] + p["enc_b1"])
    sf = h1 @ p["enc_w2"] + p["enc_b2"]
    v1 = jnp.tanh(sf @ p["val_w1"] + p["val_b1"])
    value = v1 @ p["val_w2"] + p["val_b2"]
    if action is None:
        return value, None
    ham_in = jnp.concatenate([sf, action], axis=-1)
    hh = jnp.tanh(ham_in @ p["ham_w1"] + p["ham_b1"])
    ham = hh @ p["ham_w2"] + p["ham_b2"]
    return value, ham


if __name__ == "__main__":
    # Small shapes; batch chosen NOT a multiple of the tile so the run exercises
    # both the forced 2-step grid (megacore path) and the masked partial tail
    # block (B=50 -> TB=32, grid=(2,), rows 50..63 of the last block are OOB).
    B, STATE_DIM, ACTION_DIM, HIDDEN = 50, 16, 4, 32

    key = jax.random.PRNGKey(0)
    k_params, k_state, k_action = jax.random.split(key, 3)

    raw_params = init_params(k_params, STATE_DIM, ACTION_DIM, HIDDEN)
    prepared = prepare_params(raw_params)

    state = jax.random.normal(k_state, (B, STATE_DIM), jnp.float32)
    action = jax.random.normal(k_action, (B, ACTION_DIM), jnp.float32)

    # With action
    value, ham = hjb_forward(state, action, prepared)
    value = jax.block_until_ready(value)
    ham = jax.block_until_ready(ham)

    value_ref, ham_ref = hjb_reference(state, action, raw_params)
    assert value.shape == (B, 1) and ham.shape == (B, 1)
    # enc_w2 folding / layer merging / head fusion are exact up to f32 reassociation.
    assert jnp.allclose(value, value_ref, atol=1e-4, rtol=1e-4)
    assert jnp.allclose(ham, ham_ref, atol=1e-4, rtol=1e-4)

    # Without action (hamiltonian branch skipped entirely; smaller kernel)
    value2, ham2 = hjb_forward(state, None, prepared)
    value2 = jax.block_until_ready(value2)
    assert ham2 is None
    assert jnp.allclose(value2, value_ref, atol=1e-4, rtol=1e-4)

    print("KERNEL_OK")
</pallas_src>

<mosaic_0001>
module attributes {stable_mosaic.version = 11 : i64} {
  func.func @hjb_full_kernel(%arg0: i32, %arg1: memref<32x16xf32, #tpu.memory_space<vmem>>, %arg2: memref<32x4xf32, #tpu.memory_space<vmem>>, %arg3: memref<16x32xf32, #tpu.memory_space<vmem>>, %arg4: memref<1x32xf32, #tpu.memory_space<vmem>>, %arg5: memref<32x64xf32, #tpu.memory_space<vmem>>, %arg6: memref<4x64xf32, #tpu.memory_space<vmem>>, %arg7: memref<1x64xf32, #tpu.memory_space<vmem>>, %arg8: memref<64x2xf32, #tpu.memory_space<vmem>>, %arg9: memref<1x2xf32, #tpu.memory_space<vmem>>, %arg10: memref<32x2xf32, #tpu.memory_space<vmem>>) attributes {dimension_semantics = [#tpu.dimension_semantics<parallel>], iteration_bounds = array<i64: 2>, scalar_prefetch = 0 : i64, scratch_operands = 0 : i64, tpu.core_type = #tpu.core_type<tc>, window_params = [{transform_indices = @transform_0, window_bounds = array<i64: 32, 16>}, {transform_indices = @transform_1, window_bounds = array<i64: 32, 4>}, {pipeline_mode = #tpu.pipeline_mode<synchronous>, transform_indices = @transform_2, window_bounds = array<i64: 16, 32>}, {pipeline_mode = #tpu.pipeline_mode<synchronous>, transform_indices = @transform_3, window_bounds = array<i64: 1, 32>}, {pipeline_mode = #tpu.pipeline_mode<synchronous>, transform_indices = @transform_4, window_bounds = array<i64: 32, 64>}, {pipeline_mode = #tpu.pipeline_mode<synchronous>, transform_indices = @transform_5, window_bounds = array<i64: 4, 64>}, {pipeline_mode = #tpu.pipeline_mode<synchronous>, transform_indices = @transform_6, window_bounds = array<i64: 1, 64>}, {pipeline_mode = #tpu.pipeline_mode<synchronous>, transform_indices = @transform_7, window_bounds = array<i64: 64, 2>}, {pipeline_mode = #tpu.pipeline_mode<synchronous>, transform_indices = @transform_8, window_bounds = array<i64: 1, 2>}, {transform_indices = @transform_9, window_bounds = array<i64: 32, 2>}]} {
    %c0 = arith.constant 0 : index
    %c0_0 = arith.constant 0 : index
    %0 = vector.load %arg1[%c0, %c0_0] : memref<32x16xf32, #tpu.memory_space<vmem>>, vector<32x16xf32>
    %c0_1 = arith.constant 0 : index
    %c0_2 = arith.constant 0 : index
    %1 = vector.load %arg2[%c0_1, %c0_2] : memref<32x4xf32, #tpu.memory_space<vmem>>, vector<32x4xf32>
    %c0_3 = arith.constant 0 : index
    %c0_4 = arith.constant 0 : index
    %2 = vector.load %arg3[%c0_3, %c0_4] : memref<16x32xf32, #tpu.memory_space<vmem>>, vector<16x32xf32>
    %cst = arith.constant dense<0.000000e+00> : vector<32x32xf32>
    %3 = tpu.matmul %0, %2, %cst {dimension_numbers = #tpu.dot_dimension_numbers<[1], [0], [0], [1], [0, 0, 1, 1], [], []>} : vector<32x16xf32>, vector<16x32xf32>, vector<32x32xf32> -> vector<32x32xf32>
    %c0_5 = arith.constant 0 : index
    %c0_6 = arith.constant 0 : index
    %4 = vector.load %arg4[%c0_5, %c0_6] : memref<1x32xf32, #tpu.memory_space<vmem>>, vector<1x32xf32>
    %5 = vector.broadcast %4 : vector<1x32xf32> to vector<32x32xf32>
    %6 = arith.addf %3, %5 : vector<32x32xf32>
    %7 = math.tanh %6 : vector<32x32xf32>
    %c0_7 = arith.constant 0 : index
    %c0_8 = arith.constant 0 : index
    %8 = vector.load %arg5[%c0_7, %c0_8] : memref<32x64xf32, #tpu.memory_space<vmem>>, vector<32x64xf32>
    %cst_9 = arith.constant dense<0.000000e+00> : vector<32x64xf32>
    %9 = tpu.matmul %7, %8, %cst_9 {dimension_numbers = #tpu.dot_dimension_numbers<[1], [0], [0], [1], [0, 0, 1, 1], [], []>} : vector<32x32xf32>, vector<32x64xf32>, vector<32x64xf32> -> vector<32x64xf32>
    %c0_10 = arith.constant 0 : index
    %c0_11 = arith.constant 0 : index
    %10 = vector.load %arg6[%c0_10, %c0_11] : memref<4x64xf32, #tpu.memory_space<vmem>>, vector<4x64xf32>
    %cst_12 = arith.constant dense<0.000000e+00> : vector<32x64xf32>
    %11 = tpu.matmul %1, %10, %cst_12 {dimension_numbers = #tpu.dot_dimension_numbers<[1], [0], [0], [1], [0, 0, 1, 1], [], []>} : vector<32x4xf32>, vector<4x64xf32>, vector<32x64xf32> -> vector<32x64xf32>
    %12 = arith.addf %9, %11 : vector<32x64xf32>
    %c0_13 = arith.constant 0 : index
    %c0_14 = arith.constant 0 : index
    %13 = vector.load %arg7[%c0_13, %c0_14] : memref<1x64xf32, #tpu.memory_space<vmem>>, vector<1x64xf32>
    %14 = vector.broadcast %13 : vector<1x64xf32> to vector<32x64xf32>
    %15 = arith.addf %12, %14 : vector<32x64xf32>
    %16 = math.tanh %15 : vector<32x64xf32>
    %c0_15 = arith.constant 0 : index
    %c0_16 = arith.constant 0 : index
    %17 = vector.load %arg8[%c0_15, %c0_16] : memref<64x2xf32, #tpu.memory_space<vmem>>, vector<64x2xf32>
    %cst_17 = arith.constant dense<0.000000e+00> : vector<32x2xf32>
    %18 = tpu.matmul %16, %17, %cst_17 {dimension_numbers = #tpu.dot_dimension_numbers<[1], [0], [0], [1], [0, 0, 1, 1], [], []>} : vector<32x64xf32>, vector<64x2xf32>, vector<32x2xf32> -> vector<32x2xf32>
    %c0_18 = arith.constant 0 : index
    %c0_19 = arith.constant 0 : index
    %19 = vector.load %arg9[%c0_18, %c0_19] : memref<1x2xf32, #tpu.memory_space<vmem>>, vector<1x2xf32>
    %20 = vector.broadcast %19 : vector<1x2xf32> to vector<32x2xf32>
    %21 = arith.addf %18, %20 : vector<32x2xf32>
    %c0_20 = arith.constant 0 : index
    %c0_21 = arith.constant 0 : index
    %22 = vector.load %arg10[%c0_20, %c0_21] : memref<32x2xf32, #tpu.memory_space<vmem>>, vector<32x2xf32>
    tpu.vector_store %arg10[%c0_20, %c0_21], %21 {strides = array<i32>} : memref<32x2xf32, #tpu.memory_space<vmem>>, vector<32x2xf32>,
    return
  }
  func.func @transform_0(%arg0: i32) -> (i32, i32) {
    %c0_i32 = arith.constant 0 : i32
    %c0_i32_0 = arith.constant 0 : i32
    return %arg0, %c0_i32 : i32, i32
  }
  func.func @transform_1(%arg0: i32) -> (i32, i32) {
    %c0_i32 = arith.constant 0 : i32
    %c0_i32_0 = arith.constant 0 : i32
    return %arg0, %c0_i32 : i32, i32
  }
  func.func @transform_2(%arg0: i32) -> (i32, i32) {
    %c0_i32 = arith.constant 0 : i32
    %c0_i32_0 = arith.constant 0 : i32
    %c0_i32_1 = arith.constant 0 : i32
    return %c0_i32, %c0_i32_0 : i32, i32
  }
  func.func @transform_3(%arg0: i32) -> (i32, i32) {
    %c0_i32 = arith.constant 0 : i32
    %c0_i32_0 = arith.constant 0 : i32
    %c0_i32_1 = arith.constant 0 : i32
    return %c0_i32, %c0_i32_0 : i32, i32
  }
  func.func @transform_4(%arg0: i32) -> (i32, i32) {
    %c0_i32 = arith.constant 0 : i32
    %c0_i32_0 = arith.constant 0 : i32
    %c0_i32_1 = arith.constant 0 : i32
    return %c0_i32, %c0_i32_0 : i32, i32
  }
  func.func @transform_5(%arg0: i32) -> (i32, i32) {
    %c0_i32 = arith.constant 0 : i32
    %c0_i32_0 = arith.constant 0 : i32
    %c0_i32_1 = arith.constant 0 : i32
    return %c0_i32, %c0_i32_0 : i32, i32
  }
  func.func @transform_6(%arg0: i32) -> (i32, i32) {
    %c0_i32 = arith.constant 0 : i32
    %c0_i32_0 = arith.constant 0 : i32
    %c0_i32_1 = arith.constant 0 : i32
    return %c0_i32, %c0_i32_0 : i32, i32
  }
  func.func @transform_7(%arg0: i32) -> (i32, i32) {
    %c0_i32 = arith.constant 0 : i32
    %c0_i32_0 = arith.constant 0 : i32
    %c0_i32_1 = arith.constant 0 : i32
    return %c0_i32, %c0_i32_0 : i32, i32
  }
  func.func @transform_8(%arg0: i32) -> (i32, i32) {
    %c0_i32 = arith.constant 0 : i32
    %c0_i32_0 = arith.constant 0 : i32
    %c0_i32_1 = arith.constant 0 : i32
    return %c0_i32, %c0_i32_0 : i32, i32
  }
  func.func @transform_9(%arg0: i32) -> (i32, i32) {
    %c0_i32 = arith.constant 0 : i32
    %c0_i32_0 = arith.constant 0 : i32
    return %arg0, %c0_i32 : i32, i32
  }
}

</mosaic_0001>

<bundles_post_ra>
// kernel: _hjb_full_call.1
= control target key start
LH: loop header
LB: loop body
LE: loop exit
PB: predicated region body
PF: predicated region fallthrough
CT: control target
= control target key end

     0   :  { %s1159_s30 = smov 0   ;;  %s1161_s10 = smov 0   ;;  %s1328_s0 = inlined_call_operand.vmem [shape: f32[50,16], index: 0, kind: input, shape index: {}]   ;;  %s1329_s1 = inlined_call_operand.vmem [shape: f32[50,4], index: 1, kind: input, shape index: {}]   ;;  %s1330_s2 = inlined_call_operand.vmem [shape: f32[16,32], index: 2, kind: input, shape index: {}]   ;;  %s1331_s3 = inlined_call_operand.vmem [shape: f32[1,32], index: 3, kind: input, shape index: {}]   ;;  %s1332_s4 = inlined_call_operand.vmem [shape: f32[32,64], index: 4, kind: input, shape index: {}]   ;;  %s1333_s5 = inlined_call_operand.vmem [shape: f32[4,64], index: 5, kind: input, shape index: {}]   ;;  %s1334_s6 = inlined_call_operand.vmem [shape: f32[1,64], index: 6, kind: input, shape index: {}]   ;;  %s1335_s7 = inlined_call_operand.vmem [shape: f32[64,2], index: 7, kind: input, shape index: {}]   ;;  %s1336_s8 = inlined_call_operand.vmem [shape: f32[1,2], index: 8, kind: input, shape index: {}]   ;;  %s1337_s9 = inlined_call_operand.vmem [shape: f32[50,2], index: 9, kind: output, shape index: {}]  }
   0x1   :  { %s1163_s11 = smov 0  }
   0x2 LB: > { %s1172_s12 = sadd.s32 4294967295, %s1075_s11   ;;  %s1174_s13 = sadd.s32 1, %s1075_s11   ;;  %s1075_s11 = sphi %s1163_s11, %s1344_s11   ;;  %s1071_s10 = sphi %s1161_s10, %s1343_s10   ;;  %s1067_s30 = sphi %s1159_s30, %s1342_s30  }
   0x3   : > { %s222_s14 = ssub.s32 %s1075_s11, %s1174_s13  ;;  %s225_s15 = sadd.s32 1, %s1071_s10 }
   0x4   : > { %p223_p0 = scmp.eq.s32.totalorder %s222_s14, 0  ;;  %p235_p1 = scmp.ne.s32.totalorder %s1071_s10, %s1067_s30 }
   0x5   : > { %p236_p2 = scmp.eq.s32.totalorder %s1172_s12, 1  ;;  %p863_p3 = scmp.ge.s32.totalorder %s1075_s11, 1 }
   0x6   : > { %s1182_s16 = scalar_select %p223_p0, %s1071_s10, %s225_s15  }
   0x7   : > { %p1184_p4 = por %p236_p2, %p235_p1  ;;  %p315_p5 = scmp.lt.s32.totalorder %s1075_s11, 3 }
   0x9   : > { %p316_p6 = pnand %p863_p3, %p315_p5 }
   0xa   : > { %s1195_s22 = sshll.u32 (!%p316_p6), %s1172_s12, 2  ;;  %s360_s18 = sand.u32 (!%p316_p6), 1, %s1067_s30  }
   0xb   : > { %319 = sbr.rel (%p316_p6) target bundleno = 497 (0x1f1), region = 56  ;;  %p368_p7 = scmp.lt.s32.totalorder (!%p316_p6), %s1195_s22, 6 }
   0xc   : > { %s864_s19 = sshll.u32 (!%p316_p6), %s360_s18, 5 }
  0x10   : > { %v405_v0 = vld [vmem:[%s1330_s2 + $0x8] sm:$0xff]  ;;  %v404_v1 = vld [vmem:[%s1330_s2] sm:$0xff]  ;;  %s369_s23 = scalar_select %p368_p7, %s1195_s22, 6  ;;  %vm410_vm0 = vcmask 130048   ;;  %v459_v6 = vld [vmem:[%s1332_s4 + $0x18] sm:$0xff]  ;;  %vm474_vm1 = vcmask 1043456  }
  0x11   : > { %437 = vmatpush.msra.mxu0 %v405_v0  ;;  %532 = vmatpush.msra.mxu2 %v459_v6  ;;  %v458_v7 = vld [vmem:[%s1332_s4 + $0x10] sm:$0xff]  ;;  %v457_v8 = vld [vmem:[%s1332_s4 + $0x8] sm:$0xff]  ;;  %v456_v9 = vld [vmem:[%s1332_s4] sm:$0xff]  ;;  %vm461_vm2 = vcmask 31744   ;;  %vm507_vm3 = vcmask 261120   ;;  %vm573_vm4 = vcmask 523264  }
  0x12   : > { %s866_s24 = sshll.u32 %s369_s23, 3  ;;  %v460_v10 = vld [vmem:[%s1333_s5] sm:$0xf]  ;;  %v568_v17 = vld [vmem:[%s1335_s7 + $0x38] sm:$0xff]  ;;  %v567_v18 = vld [vmem:[%s1335_s7 + $0x30] sm:$0xff]  ;;  %vm615_vm5 = vcmask 15360  }
  0x13   : > { %438 = vmatpush.msra.mxu0 %v404_v1  ;;  %s371_s27 = scalar_lea.vmem %s1328_s0, %s866_s24  ;;  %533 = vmatpush.msra.mxu2 %v458_v7  ;;  %v1002_v13 = vld [vmem:[%s1331_s3] ss:$0 sm:$0xff]  ;;  %v566_v30 = vld [vmem:[%s1335_s7 + $0x28] sm:$0xff]  ;;  %v564_v32 = vld [vmem:[%s1335_s7 + $0x18] sm:$0xff]  ;;  %s1266_s23 = scalar_lea.vmem [#allocation2], %s864_s19  }
  0x14   : > { %v396_v2 = vld [vmem:[%s371_s27] sm:$0xff]  ;;  %v397_v3 = vld [vmem:[%s371_s27 + $0x8] sm:$0xff]  ;;  %v398_v4 = vld [vmem:[%s371_s27 + $0x10] sm:$0xff]  ;;  %873 = vmatpush.msk.msra.mxu1 %vm474_vm1, %v460_v10  ;;  %906 = vmatpush.msra.mxu3 %v568_v17  ;;  %s628_s30 = ssub.s32 (%p1184_p4), 7, %s1195_s22  ;;  %s903_s25 = sshll.u32 (%p1184_p4), %s1172_s12, 5 }
  0x15   : > { %869 = vmatmul.msk.f32.vlgmr.msra.gmra.mxu0 %vm410_vm0, %v396_v2  ;;  %v399_v5 = vld [vmem:[%s371_s27 + $0x18] sm:$0xff]  ;;  %534 = vmatpush.msra.mxu2 %v457_v8  ;;  %s385_s27 = scalar_lea.vmem %s1329_s1, %s866_s24  ;;  %v565_v31 = vld [vmem:[%s1335_s7 + $0x20] sm:$0xff]  ;;  %v563_v33 = vld [vmem:[%s1335_s7 + $0x10] sm:$0xff]  ;;  %p629_p8 = scmp.lt.s32.totalorder (%p1184_p4), %s628_s30, 4 }
  0x16   : > { %v400_v11 = vld [vmem:[%s385_s27] sm:$0xff]  ;;  %v401_v12 = vld [vmem:[%s385_s27 + $0x8] sm:$0xff]  ;;  %v402_v14 = vld [vmem:[%s385_s27 + $0x10] sm:$0xff]  ;;  %594 = vmatpush.msrb.mxu1 %v568_v17  ;;  %907 = vmatpush.msra.mxu3 %v567_v18  ;;  %s1279_s28 = scalar_lea.vmem (%p1184_p4), %s1337_s9, %s903_s25  }
  0x17   : > { %535 = vmatpush.msra.mxu2 %v456_v9  ;;  %874 = vmatmul.msk.f32.vlgmr.msra.gmra.mxu1 %vm461_vm2, %v400_v11  ;;  %v403_v19 = vld [vmem:[%s385_s27 + $0x18] sm:$0xff]  ;;  %v562_v34 = vld [vmem:[%s1335_s7 + $0x8] sm:$0xff]  ;;  %v561_v35 = vld [vmem:[%s1335_s7] sm:$0xff] }
  0x18   : > { %595 = vmatpush.msrb.mxu1 %v567_v18  ;;  %908 = vmatpush.msra.mxu3 %v566_v30  ;;  %v1003_v37 = vld [vmem:[%s1334_s6] ss:$0 sm:$0xff] }
  0x19   : > { %v1004_v57 = vld [vmem:[%s1336_s8] ss:$0 sm:$0xff] }
  0x1a   : > { %596 = vmatpush.msrb.mxu1 %v566_v30  ;;  %909 = vmatpush.msra.mxu3 %v565_v31 }
  0x1c   : > { %597 = vmatpush.msrb.mxu1 %v565_v31  ;;  %910 = vmatpush.msra.mxu3 %v564_v32 }
  0x1d   : > { %870 = vmatmul.msk.f32.gmra.mxu0 %vm410_vm0, %v397_v3 }
  0x1e   : > { %598 = vmatpush.msrb.mxu1 %v564_v32  ;;  %911 = vmatpush.msra.mxu3 %v563_v33 }
  0x1f   : > { %875 = vmatmul.msk.f32.gmra.mxu1 %vm461_vm2, %v401_v12 }
  0x20   : > { %599 = vmatpush.msrb.mxu1 %v563_v33  ;;  %912 = vmatpush.msra.mxu3 %v562_v34 }
  0x22   : > { %600 = vmatpush.msrb.mxu1 %v562_v34  ;;  %913 = vmatpush.msra.mxu3 %v561_v35 }
  0x24   : > { %601 = vmatpush.msrb.mxu1 %v561_v35 }
  0x25   : > { %871 = vmatmul.msk.f32.gmra.mxu0 %vm410_vm0, %v398_v4 }
  0x27   : > { %876 = vmatmul.msk.f32.gmra.mxu1 %vm461_vm2, %v402_v14 }
  0x2d   : > { %872 = vmatmul.msk.f32.gmra.mxu0 %vm410_vm0, %v399_v5 }
  0x2f   : > { %877 = vmatmul.msk.f32.gmra.mxu1 %vm461_vm2, %v403_v19 }
  0x92   : > { %v440_v15 = vpop.f32.mrf.mxu0 }
  0x93   : > { %v441_v16 = vadd.f32 %v1002_v13, %v440_v15 }
  0x94   : > { %v495_v36 = vpop.f32.mrf.mxu1 }
  0x95   : > { %1005 = vtanh.f32 %v441_v16 }
  0x9a   : > { %v443_v20 = vpop.f32.mrf.mxu0 }
  0x9b   : > { %v1006_v21 = vpop.eup %1005  ;;  %v444_v22 = vadd.f32 %v1002_v13, %v443_v20 }
  0x9c   : > { %878 = vmatmul.msk.f32.vlgmr.msra.gmra.mxu2 %vm507_vm3, %v1006_v21  ;;  %v498_v40 = vpop.f32.mrf.mxu1 }
  0x9d   : > { %1007 = vtanh.f32 %v444_v22 }
  0xa2   : > { %v446_v23 = vpop.f32.mrf.mxu0 }
  0xa3   : > { %v1008_v24 = vpop.eup %1007  ;;  %v447_v25 = vadd.f32 %v1002_v13, %v446_v23 }
  0xa4   : > { %879 = vmatmul.msk.f32.gmra.mxu2 %vm507_vm3, %v1008_v24  ;;  %v501_v46 = vpop.f32.mrf.mxu1 }
  0xa5   : > { %1009 = vtanh.f32 %v447_v25 }
  0xaa   : > { %v449_v26 = vpop.f32.mrf.mxu0 }
  0xab   : > { %v1010_v27 = vpop.eup %1009  ;;  %v450_v28 = vadd.f32 %v1002_v13, %v449_v26 }
  0xac   : > { %880 = vmatmul.msk.f32.gmra.mxu2 %vm507_vm3, %v1010_v27  ;;  %v504_v51 = vpop.f32.mrf.mxu1 }
  0xad   : > { %1011 = vtanh.f32 %v450_v28 }
  0xb3   : > { %v1012_v29 = vpop.eup %1011 }
  0xb4   : > { %881 = vmatmul.msk.f32.gmra.mxu2 %vm507_vm3, %v1012_v29 }
 0x11f   : > { %v537_v38 = vpop.f32.mrf.mxu2 }
 0x120   : > { %v538_v39 = vadd.f32 %v537_v38, %v495_v36 }
 0x122   : > { %v553_v41 = vadd.f32 %v1003_v37, %v538_v39 }
 0x124   : > { %1013 = vtanh.f32 %v553_v41 }
 0x127   : > { %v540_v42 = vpop.f32.mrf.mxu2 }
 0x128   : > { %v541_v43 = vadd.f32 %v540_v42, %v498_v40 }
 0x12a   : > { %v1014_v44 = vpop.eup %1013  ;;  %v554_v45 = vadd.f32 %v1003_v37, %v541_v43 }
 0x12b   : > { %882 = vmatmul.msk.f32.vlgmr.msrb.gmra.mxu1 %vm573_vm4, %v1014_v44 }
 0x12c   : > { %1015 = vtanh.f32 %v554_v45 }
 0x12f   : > { %v543_v47 = vpop.f32.mrf.mxu2 }
 0x130   : > { %v544_v48 = vadd.f32 %v543_v47, %v501_v46 }
 0x132   : > { %v1016_v49 = vpop.eup %1015  ;;  %v555_v50 = vadd.f32 %v1003_v37, %v544_v48 }
 0x133   : > { %883 = vmatmul.msk.f32.vlgmr.msra.gmra.mxu3 %vm573_vm4, %v1016_v49 }
 0x134   : > { %1017 = vtanh.f32 %v555_v50 }
 0x137   : > { %v546_v52 = vpop.f32.mrf.mxu2 }
 0x138   : > { %v547_v53 = vadd.f32 %v546_v52, %v504_v51 }
 0x13a   : > { %v1018_v54 = vpop.eup %1017  ;;  %v556_v55 = vadd.f32 %v1003_v37, %v547_v53 }
 0x13b   : > { %884 = vmatmul.msk.f32.gmra.mxu3 %vm573_vm4, %v1018_v54 }
 0x13c   : > { %1019 = vtanh.f32 %v556_v55 }
 0x142   : > { %v1020_v56 = vpop.eup %1019 }
 0x143   : > { %885 = vmatmul.msk.f32.gmra.mxu3 %vm573_vm4, %v1020_v56 }
 0x1a8   : > { %v603_v58 = vpop.f32.mrf.mxu1 }
 0x1a9   : > { %v604_v59 = vadd.f32 %v1004_v57, %v603_v58 }
 0x1ab   : > { %616 = vst.msk [vmem:[%s1266_s23] sm:$0xff] %vm615_vm5, %v604_v59 }
 0x1b6   : > { %v606_v60 = vpop.f32.mrf.mxu3 }
 0x1b7   : > { %v607_v61 = vadd.f32 %v1004_v57, %v606_v60 }
 0x1b9   : > { %617 = vst.msk [vmem:[%s1266_s23 + $0x8] sm:$0xff] %vm615_vm5, %v607_v61 }
 0x1be   : > { %v609_v62 = vpop.f32.mrf.mxu3 }
 0x1bf   : > { %v610_v63 = vadd.f32 %v1004_v57, %v609_v62 }
 0x1c1   : > { %618 = vst.msk [vmem:[%s1266_s23 + $0x10] sm:$0xff] %vm615_vm5, %v610_v63 }
 0x1c5   : > { %626 = sbr.rel (!%p1184_p4) target bundleno = 497 (0x1f1), region = 60 }
 0x1c6   : > { %v612_v0 = vpop.f32.mrf.mxu3 }
 0x1c7   : > { %v613_v1 = vadd.f32 %v1004_v57, %v612_v0 }
 0x1c9   : > { %619 = vst.msk [vmem:[%s1266_s23 + $0x18] sm:$0xff] %vm615_vm5, %v613_v1 }
 0x1ca   : > { %s1346_s30 = smov (!%p629_p8, %s628_s30), 4 }
 0x1cb   : > { %s888_s29 = sshll.u32 %s1346_s30, 3 }
 0x1cc   : > { %p891_p9 = scmp.eq.s32.totalorder %s888_s29, 0 }
 0x1cd   : > { %s1285_s11 = sshrl.u32 (!%p891_p9), %s1346_s30, 2 }
 0x1ce   : > { %637 = sbr.rel (%p891_p9) target bundleno = 497 (0x1f1), region = 64  ;;  %p892_p10 = scmp.le.s32.totalorder (!%p891_p9), %s1285_s11, 0 }
 0x1d3   : > { %810 = sbr.rel (%p892_p10) target bundleno = 480 (0x1e0), region = 143  ;;  %s1339_s12 = smov (!%p892_p10), %s1279_s28 }
 0x1d4   : > { %s1340_s17 = smov (!%p892_p10), %s1266_s23  ;;  %s1294_s22 = smov (!%p892_p10), 0  }
 0x1d5   : > { %s1089_s14 = smov (!%p892_p10), 0  }
 0x1d8 LB: >> { %v706_v2 = vld [vmem:[%s1083_s17] sm:$0xff]  ;;  %v708_v3 = vld [vmem:[%s1083_s17 + $0x8] sm:$0xff]  ;;  %v710_v4 = vld [vmem:[%s1083_s17 + $0x10] sm:$0xff]  ;;  %s714_s24 = sadd.s32 1, %s1087_s22  ;;  %s700_s14 = sadd.s32 1, %s1091_s14   ;;  %s1091_s14 = sphi %s1089_s14, %s700_s14   ;;  %s1087_s22 = sphi %s1294_s22, %s1341_s22   ;;  %s1083_s17 = sphi %s1340_s17, %s719_s17   ;;  %s1079_s12 = sphi %s1339_s12, %s720_s12  }
 0x1d9   : >> { %707 = vst [vmem:[%s1079_s12] sm:$0xff] %v706_v2  ;;  %v712_v5 = vld [vmem:[%s1083_s17 + $0x18] sm:$0xff]  ;;  %p715_p11 = scmp.ge.s32.totalorder %s714_s24, %s1285_s11  ;;  %p699_p12 = scmp.ge.s32.totalorder %s700_s14, %s1285_s11 }
 0x1da   : >> { %709 = vst [vmem:[%s1079_s12 + $0x8] sm:$0xff] %v708_v3 }
 0x1db   : >> { %711 = vst [vmem:[%s1079_s12 + $0x10] sm:$0xff] %v710_v4  ;;  %s1348_s24 = smov (%p715_p11, %s714_s24), 0  ;;  %702 = sbr.rel (!%p699_p12) target bundleno = 472 (0x1d8), region = 149 }
 0x1dc   : >> { %713 = vst [vmem:[%s1079_s12 + $0x18] sm:$0xff] %v712_v5  ;;  %s893_s15 = sshll.u32 %s1348_s24, 5  ;;  %s1341_s22 = smov %s1348_s24 }
 0x1dd   : >> { %s719_s17 = scalar_lea.vmem %s1266_s23, %s893_s15 [#allocation2]   ;;  %s720_s12 = scalar_lea.vmem %s1279_s28, %s893_s15  }
 0x1e0 PF: > { %s1310_s18 = sand.u32 3, %s1346_s30   ;;  %s904_s19 = sshll.u32 %s1285_s11, 5 }
 0x1e1   : > { %s725_s20 = scalar_lea.vmem %s1266_s23, %s904_s19 [#allocation2]   ;;  %s727_s21 = scalar_lea.vmem %s1279_s28, %s904_s19  }
 0x1e2   : > { %p898_p13 = scmp.le.s32.totalorder %s1310_s18, 0 }
 0x1e3   : > { %s1093_s25 = smov (!%p898_p13), %s727_s21   ;;  %s1097_s26 = smov (!%p898_p13), %s725_s20  }
 0x1e4   : > { %824 = sbr.rel (%p898_p13) target bundleno = 497 (0x1f1), region = 154  ;;  %s1101_s27 = smov (!%p898_p13), 0  }
 0x1e5   : > { %s1105_s29 = smov (!%p898_p13), 0  }
 0x1e9 LB: >> { %v737_v6 = vld [vmem:[%s1099_s26] sm:$0xff]  ;;  %s739_s30 = sadd.s32 1, %s1103_s27  ;;  %s731_s29 = sadd.s32 1, %s1107_s29   ;;  %s1107_s29 = sphi %s1105_s29, %s731_s29   ;;  %s1103_s27 = sphi %s1101_s27, %s1102_s27   ;;  %s1099_s26 = sphi %s1097_s26, %s744_s26   ;;  %s1095_s25 = sphi %s1093_s25, %s745_s25  }
 0x1ea   : >> { %738 = vst [vmem:[%s1095_s25] sm:$0xff] %v737_v6  ;;  %p740_p0 = scmp.ge.s32.totalorder %s739_s30, %s1310_s18  ;;  %p730_p1 = scmp.ge.s32.totalorder %s731_s29, %s1310_s18 }
 0x1ec   : >> { %s1350_s30 = smov (%p740_p0, %s739_s30), 0  ;;  %733 = sbr.rel (!%p730_p1) target bundleno = 489 (0x1e9), region = 160 }
 0x1ed   : >> { %s899_s23 = sshll.u32 %s1350_s30, 3  ;;  %s1102_s27 = smov %s1350_s30  }
 0x1ee   : >> { %s744_s26 = scalar_lea.vmem %s725_s20, %s899_s23 [#allocation2]   ;;  %s745_s25 = scalar_lea.vmem %s727_s21, %s899_s23  }
 0x1f1 PF: > { %p16_p2 = scmp.ge.s32.totalorder %s1174_s13, 4   ;;  %s1342_s30 = smov %s1071_s10 }
 0x1f2   : > { %s1343_s10 = smov %s1182_s16  ;;  %s1344_s11 = smov %s1174_s13 }
 0x1f3   :  { %18 = sbr.rel (!%p16_p2) target bundleno = 2 (0x2), region = 171 }

</bundles_post_ra>
